<compile_context>
chip_gen: v7x
topology: tpu7x:2x2x1
jax: 0.10.0
libtpu: 0.0.40
codegen_flags: <defaults>
</compile_context>

<pallas_src>
import functools
import math

import jax
import jax.numpy as jnp
from jax.experimental import pallas as pl
from jax.experimental.pallas import tpu as pltpu


def _lora_linear_kernel(x_ref, wt_ref, b_ref, xa_ref, bb_ref, o_ref, acc_ref):
    """One (tile_m, tile_n) output block, accumulated over the K grid axis."""
    k = pl.program_id(2)

    @pl.when(k == 0)
    def _():
        acc_ref[...] = jnp.zeros_like(acc_ref)

    # Base path: canonical (M,K) x (K,N) MXU matmul (W pre-transposed to
    # (in, out) in the wrapper -> no XLU transpose of the weight slab).
    acc_ref[...] += jnp.dot(x_ref[...], wt_ref[...],
                            preferred_element_type=jnp.float32)

    @pl.when(k == pl.num_programs(2) - 1)
    def _():
        # LoRA epilogue: xa = scale * (x @ A) was precomputed in the wrapper,
        # so the scale multiply already happened on the rank-sized
        # intermediate and x@A is not recomputed per N tile.
        lora = jnp.dot(xa_ref[...], bb_ref[...],
                       preferred_element_type=jnp.float32)
        o_ref[...] = (acc_ref[...] + lora + b_ref[...]).astype(o_ref.dtype)


def _round_up(v, m):
    return ((v + m - 1) // m) * m


def _pick_tile(dim_pad, prefs=(512, 256, 128)):
    # dim_pad is always a multiple of 128, so this always returns.
    for cand in prefs:
        if dim_pad % cand == 0:
            return cand
    return dim_pad


def _vmem_capacity_bytes():
    try:
        return int(pltpu.get_tpu_info().vmem_capacity_bytes)
    except Exception:
        return 64 * 1024 * 1024  # conservative (v7x per-TC physical)


def linear_with_lora(x, w, b, A, B, alpha=16, compute_dtype=None):
    """Fused LinearWithLoRA forward.

    x: (..., in_features)
    w: (out_features, in_features)  -- frozen base weight (PyTorch layout)
    b: (out_features,)
    A: (in_features, rank)
    B: (rank, out_features)
    Returns x @ w.T + b + (alpha/rank) * ((x @ A) @ B), in x.dtype.
    """
    in_dim = x.shape[-1]
    out_dim = w.shape[0]
    rank = A.shape[1]
    scale = float(alpha) / float(rank)          # compile-time constant

    lead_shape = x.shape[:-1]
    out_dtype = x.dtype
    op_dtype = jnp.dtype(compute_dtype) if compute_dtype is not None else x.dtype

    x2d = x.reshape(-1, in_dim)
    M = x2d.shape[0]

    # ---- LoRA intermediate: xa = scale * (x @ A), computed once ------------
    xa = jnp.dot(x2d.astype(jnp.float32), A.astype(jnp.float32),
                 preferred_element_type=jnp.float32) * scale      # (M, rank) f32

    # ---- tile selection (dtype-aware sublane multiple) ----------------------
    sub = 16 if op_dtype == jnp.bfloat16 else 8
    tile_m = min(256, _round_up(M, sub))
    m_pad = _round_up(M, tile_m)

    k_pad = _round_up(in_dim, 128)
    tile_k = _pick_tile(k_pad)

    n_pad = _round_up(out_dim, 128)
    tile_n = _pick_tile(n_pad)

    r_pad = _round_up(rank, 128)                # lane-dense LoRA operands

    # ---- pad operands (zeros are exact for matmul contributions) -----------
    x2d = x2d.astype(op_dtype)
    if (m_pad, k_pad) != (M, in_dim):
        x2d = jnp.pad(x2d, ((0, m_pad - M), (0, k_pad - in_dim)))

    # W transposed once to (in, out): canonical MXU layout.  W is frozen, so
    # in a full training loop this (and the pads below) should be cached
    # outside the step function.
    wt = jnp.swapaxes(w, 0, 1).astype(op_dtype)                   # (in, out)
    if (k_pad, n_pad) != (in_dim, out_dim):
        wt = jnp.pad(wt, ((0, k_pad - in_dim), (0, n_pad - out_dim)))

    b2d = b.reshape(1, out_dim).astype(jnp.float32)               # f32 bias add
    if n_pad != out_dim:
        b2d = jnp.pad(b2d, ((0, 0), (0, n_pad - out_dim)))

    xa = xa.astype(op_dtype)
    if (m_pad, r_pad) != (M, rank):
        xa = jnp.pad(xa, ((0, m_pad - M), (0, r_pad - rank)))

    Bp = B.astype(op_dtype)
    if (r_pad, n_pad) != (rank, out_dim):
        Bp = jnp.pad(Bp, ((0, r_pad - rank), (0, n_pad - out_dim)))

    num_m = m_pad // tile_m
    num_n = n_pad // tile_n
    num_k = k_pad // tile_k

    # ---- explicit VMEM budget from actual (double-buffered) tile bytes -----
    isz = jnp.dtype(op_dtype).itemsize
    osz = jnp.dtype(out_dtype).itemsize
    tile_bytes = (tile_m * tile_k * isz        # x
                  + tile_k * tile_n * isz      # W^T
                  + tile_n * 4                 # bias (f32)
                  + tile_m * r_pad * isz       # xa
                  + r_pad * tile_n * isz       # B
                  + tile_m * tile_n * osz)     # out
    vmem_bytes = 2 * tile_bytes + tile_m * tile_n * 4   # + f32 accumulator
    vmem_limit = int(vmem_bytes * 1.5) + (2 << 20)
    vmem_limit = max(vmem_limit, 16 << 20)
    vmem_limit = min(vmem_limit, int(_vmem_capacity_bytes() * 0.9))

    out2d = pl.pallas_call(
        _lora_linear_kernel,
        out_shape=jax.ShapeDtypeStruct((m_pad, n_pad), out_dtype),
        grid_spec=pltpu.PrefetchScalarGridSpec(
            num_scalar_prefetch=0,
            # M outer, N middle, K inner (reduction last). xa / out block
            # indices are invariant over K -> accumulator pattern; xa is also
            # invariant over N so it stays VMEM-resident for a whole M tile.
            grid=(num_m, num_n, num_k),
            in_specs=[
                pl.BlockSpec((tile_m, tile_k), lambda i, j, k: (i, k)),   # x
                pl.BlockSpec((tile_k, tile_n), lambda i, j, k: (k, j)),   # W^T
                pl.BlockSpec((1, tile_n),      lambda i, j, k: (0, j)),   # bias
                pl.BlockSpec((tile_m, r_pad),  lambda i, j, k: (i, 0)),   # xa
                pl.BlockSpec((r_pad, tile_n),  lambda i, j, k: (0, j)),   # B
            ],
            out_specs=pl.BlockSpec((tile_m, tile_n), lambda i, j, k: (i, j)),
            scratch_shapes=[pltpu.VMEM((tile_m, tile_n), jnp.float32)],
        ),
        compiler_params=pltpu.CompilerParams(
            dimension_semantics=("parallel", "parallel", "arbitrary"),
            vmem_limit_bytes=vmem_limit,
        ),
    )(x2d, wt, b2d, xa, Bp)

    out2d = out2d[:M, :out_dim]
    return out2d.reshape(*lead_shape, out_dim)


if __name__ == "__main__":
    def ref_fn(x, w, b, A, B, alpha):
        r = A.shape[1]
        xf, wf, bf, Af, Bf = (t.astype(jnp.float32) for t in (x, w, b, A, B))
        return xf @ wf.T + bf + (alpha / r) * ((xf @ Af) @ Bf)

    # ---- test 1: small module-consistent shapes (single block) -------------
    key = jax.random.PRNGKey(0)
    batch, seq, in_dim, out_dim, rank, alpha = 2, 8, 32, 32, 16, 16
    k_x, k_w, k_b, k_a = jax.random.split(key, 4)
    bound = 1.0 / math.sqrt(in_dim)
    w = jax.random.uniform(k_w, (out_dim, in_dim), jnp.float32, -bound, bound)
    b = jax.random.uniform(k_b, (out_dim,), jnp.float32, -bound, bound)
    A = jax.random.normal(k_a, (in_dim, rank), jnp.float32) * 0.01
    B = jnp.zeros((rank, out_dim), jnp.float32)        # LoRA B starts at zero
    x = jax.random.normal(k_x, (batch, seq, in_dim), jnp.float32)

    out = linear_with_lora(x, w, b, A, B, alpha=alpha)
    jax.block_until_ready(out)
    assert out.shape == (batch, seq, out_dim)
    assert jnp.allclose(out, ref_fn(x, w, b, A, B, alpha), atol=1e-3, rtol=1e-3)

    # ---- test 2: K-tiled + M/N padding path with non-zero LoRA B -----------
    batch2, seq2, in2, out2, rank2 = 4, 96, 200, 384, 8   # K->256 pad, M=384->512
    k2 = jax.random.PRNGKey(1)
    k_x2, k_w2, k_b2, k_a2, k_bl2 = jax.random.split(k2, 5)
    bound2 = 1.0 / math.sqrt(in2)
    w2 = jax.random.uniform(k_w2, (out2, in2), jnp.float32, -bound2, bound2)
    b2 = jax.random.uniform(k_b2, (out2,), jnp.float32, -bound2, bound2)
    A2 = jax.random.normal(k_a2, (in2, rank2), jnp.float32) * 0.01
    B2 = jax.random.normal(k_bl2, (rank2, out2), jnp.float32) * 0.1
    x2 = jax.random.normal(k_x2, (batch2, seq2, in2), jnp.float32)

    out_t2 = linear_with_lora(x2, w2, b2, A2, B2, alpha=16)
    jax.block_until_ready(out_t2)
    ref_t2 = ref_fn(x2, w2, b2, A2, B2, 16)
    assert out_t2.shape == (batch2, seq2, out2)
    assert jnp.allclose(out_t2, ref_t2, atol=1e-3, rtol=1e-3)

    # ---- test 3: bf16 params/activations (MXU-friendly path) ---------------
    out_bf = linear_with_lora(
        x2.astype(jnp.bfloat16), w2.astype(jnp.bfloat16), b2,
        A2.astype(jnp.bfloat16), B2.astype(jnp.bfloat16), alpha=16)
    jax.block_until_ready(out_bf)
    assert jnp.allclose(out_bf.astype(jnp.float32), ref_t2, atol=2e-1, rtol=2e-1)

    # ---- test 4: f32 inputs with bf16 compute (explicit opt-in) ------------
    out_cd = linear_with_lora(x2, w2, b2, A2, B2, alpha=16,
                              compute_dtype=jnp.bfloat16)
    jax.block_until_ready(out_cd)
    assert jnp.allclose(out_cd, ref_t2, atol=2e-1, rtol=2e-1)

    print("KERNEL_OK")
</pallas_src>

<mosaic_0001>
module attributes {stable_mosaic.version = 11 : i64} {
  func.func @_lora_linear_kernel(%arg0: i32, %arg1: i32, %arg2: i32, %arg3: memref<16x128xf32, #tpu.memory_space<vmem>>, %arg4: memref<128x128xf32, #tpu.memory_space<vmem>>, %arg5: memref<1x128xf32, #tpu.memory_space<vmem>>, %arg6: memref<16x128xf32, #tpu.memory_space<vmem>>, %arg7: memref<128x128xf32, #tpu.memory_space<vmem>>, %arg8: memref<16x128xf32, #tpu.memory_space<vmem>>, %arg9: memref<16x128xf32, #tpu.memory_space<vmem>>) attributes {dimension_semantics = [#tpu.dimension_semantics<parallel>, #tpu.dimension_semantics<parallel>, #tpu.dimension_semantics<arbitrary>], iteration_bounds = array<i64: 1, 1, 1>, scalar_prefetch = 0 : i64, scratch_operands = 1 : i64, tpu.core_type = #tpu.core_type<tc>, window_params = [{transform_indices = @transform_0, window_bounds = array<i64: 16, 128>}, {transform_indices = @transform_1, window_bounds = array<i64: 128, 128>}, {transform_indices = @transform_2, window_bounds = array<i64: 1, 128>}, {transform_indices = @transform_3, window_bounds = array<i64: 16, 128>}, {transform_indices = @transform_4, window_bounds = array<i64: 128, 128>}, {transform_indices = @transform_5, window_bounds = array<i64: 16, 128>}]} {
    %c0_i32 = arith.constant 0 : i32
    %0 = arith.cmpi eq, %arg2, %c0_i32 : i32
    %1 = arith.extui %0 : i1 to i32
    %c0_i32_0 = arith.constant 0 : i32
    %2 = arith.cmpi ne, %1, %c0_i32_0 : i32
    scf.if %2 {
      %cst_10 = arith.constant 0.000000e+00 : f32
      %12 = vector.broadcast %cst_10 : f32 to vector<16x128xf32>
      %c0_11 = arith.constant 0 : index
      %c0_12 = arith.constant 0 : index
      %13 = vector.load %arg9[%c0_11, %c0_12] : memref<16x128xf32, #tpu.memory_space<vmem>>, vector<16x128xf32>
      tpu.vector_store %arg9[%c0_11, %c0_12], %12 {strides = array<i32>} : memref<16x128xf32, #tpu.memory_space<vmem>>, vector<16x128xf32>,
    } else {
    }
    %c0 = arith.constant 0 : index
    %c0_1 = arith.constant 0 : index
    %3 = vector.load %arg9[%c0, %c0_1] : memref<16x128xf32, #tpu.memory_space<vmem>>, vector<16x128xf32>
    %c0_2 = arith.constant 0 : index
    %c0_3 = arith.constant 0 : index
    %4 = vector.load %arg3[%c0_2, %c0_3] : memref<16x128xf32, #tpu.memory_space<vmem>>, vector<16x128xf32>
    %c0_4 = arith.constant 0 : index
    %c0_5 = arith.constant 0 : index
    %5 = vector.load %arg4[%c0_4, %c0_5] : memref<128x128xf32, #tpu.memory_space<vmem>>, vector<128x128xf32>
    %cst = arith.constant dense<0.000000e+00> : vector<16x128xf32>
    %6 = tpu.matmul %4, %5, %cst {dimension_numbers = #tpu.dot_dimension_numbers<[1], [0], [0], [1], [0, 0, 1, 1], [], []>} : vector<16x128xf32>, vector<128x128xf32>, vector<16x128xf32> -> vector<16x128xf32>
    %7 = arith.addf %3, %6 : vector<16x128xf32>
    %c0_6 = arith.constant 0 : index
    %c0_7 = arith.constant 0 : index
    %8 = vector.load %arg9[%c0_6, %c0_7] : memref<16x128xf32, #tpu.memory_space<vmem>>, vector<16x128xf32>
    tpu.vector_store %arg9[%c0_6, %c0_7], %7 {strides = array<i32>} : memref<16x128xf32, #tpu.memory_space<vmem>>, vector<16x128xf32>,
    %c0_i32_8 = arith.constant 0 : i32
    %9 = arith.cmpi eq, %arg2, %c0_i32_8 : i32
    %10 = arith.extui %9 : i1 to i32
    %c0_i32_9 = arith.constant 0 : i32
    %11 = arith.cmpi ne, %10, %c0_i32_9 : i32
    scf.if %11 {
      %c0_10 = arith.constant 0 : index
      %c0_11 = arith.constant 0 : index
      %12 = vector.load %arg6[%c0_10, %c0_11] : memref<16x128xf32, #tpu.memory_space<vmem>>, vector<16x128xf32>
      %c0_12 = arith.constant 0 : index
      %c0_13 = arith.constant 0 : index
      %13 = vector.load %arg7[%c0_12, %c0_13] : memref<128x128xf32, #tpu.memory_space<vmem>>, vector<128x128xf32>
      %cst_14 = arith.constant dense<0.000000e+00> : vector<16x128xf32>
      %14 = tpu.matmul %12, %13, %cst_14 {dimension_numbers = #tpu.dot_dimension_numbers<[1], [0], [0], [1], [0, 0, 1, 1], [], []>} : vector<16x128xf32>, vector<128x128xf32>, vector<16x128xf32> -> vector<16x128xf32>
      %c0_15 = arith.constant 0 : index
      %c0_16 = arith.constant 0 : index
      %15 = vector.load %arg9[%c0_15, %c0_16] : memref<16x128xf32, #tpu.memory_space<vmem>>, vector<16x128xf32>
      %16 = arith.addf %15, %14 : vector<16x128xf32>
      %c0_17 = arith.constant 0 : index
      %c0_18 = arith.constant 0 : index
      %17 = vector.load %arg5[%c0_17, %c0_18] : memref<1x128xf32, #tpu.memory_space<vmem>>, vector<1x128xf32>
      %18 = vector.broadcast %17 : vector<1x128xf32> to vector<16x128xf32>
      %19 = arith.addf %16, %18 : vector<16x128xf32>
      %c0_19 = arith.constant 0 : index
      %c0_20 = arith.constant 0 : index
      %20 = vector.load %arg8[%c0_19, %c0_20] : memref<16x128xf32, #tpu.memory_space<vmem>>, vector<16x128xf32>
      tpu.vector_store %arg8[%c0_19, %c0_20], %19 {strides = array<i32>} : memref<16x128xf32, #tpu.memory_space<vmem>>, vector<16x128xf32>,
    } else {
    }
    return
  }
  func.func @transform_0(%arg0: i32, %arg1: i32, %arg2: i32) -> (i32, i32) {
    %c0_i32 = arith.constant 0 : i32
    return %arg0, %arg2 : i32, i32
  }
  func.func @transform_1(%arg0: i32, %arg1: i32, %arg2: i32) -> (i32, i32) {
    %c0_i32 = arith.constant 0 : i32
    return %arg2, %arg1 : i32, i32
  }
  func.func @transform_2(%arg0: i32, %arg1: i32, %arg2: i32) -> (i32, i32) {
    %c0_i32 = arith.constant 0 : i32
    %c0_i32_0 = arith.constant 0 : i32
    return %c0_i32, %arg1 : i32, i32
  }
  func.func @transform_3(%arg0: i32, %arg1: i32, %arg2: i32) -> (i32, i32) {
    %c0_i32 = arith.constant 0 : i32
    %c0_i32_0 = arith.constant 0 : i32
    return %arg0, %c0_i32 : i32, i32
  }
  func.func @transform_4(%arg0: i32, %arg1: i32, %arg2: i32) -> (i32, i32) {
    %c0_i32 = arith.constant 0 : i32
    %c0_i32_0 = arith.constant 0 : i32
    return %c0_i32, %arg1 : i32, i32
  }
  func.func @transform_5(%arg0: i32, %arg1: i32, %arg2: i32) -> (i32, i32) {
    %c0_i32 = arith.constant 0 : i32
    return %arg0, %arg1 : i32, i32
  }
}

</mosaic_0001>

<bundles_post_ra>
// kernel: tpu_custom_call.1
= control target key start
LH: loop header
LB: loop body
LE: loop exit
PB: predicated region body
PF: predicated region fallthrough
CT: control target
= control target key end

     0   :  { %10 = vsyncpa [#allocation4], 0  ;;  %s738_s0 = inlined_call_operand.hbm [shape: f32[16,128], index: 0, kind: input, shape index: {}]   ;;  %s739_s1 = inlined_call_operand.hbm [shape: f32[128,128], index: 1, kind: input, shape index: {}]   ;;  %s740_s2 = inlined_call_operand.vmem [shape: f32[1,128], index: 2, kind: input, shape index: {}]   ;;  %s741_s3 = inlined_call_operand.hbm [shape: f32[16,128], index: 3, kind: input, shape index: {}]   ;;  %s742_s4 = inlined_call_operand.hbm [shape: f32[128,128], index: 4, kind: input, shape index: {}]   ;;  %s743_s5 = inlined_call_operand.hbm [shape: f32[16,128], index: 5, kind: output, shape index: {}]  }
   0x1   :  { %11 = vsyncpa [#allocation7], 0 }
   0x2   :  { %12 = vsyncpa [#allocation10], 0 }
   0x3   :  { %13 = vsyncpa [#allocation5], 0  ;;  %s609_s18 = smov [#allocation6]   ;;  %s610_s20 = smov [#allocation3]  }
   0x4   :  { %s31_s19 = sshll.u32 %s609_s18, 4  ;;  %s19_s21 = sshll.u32 %s610_s20, 4  ;;  %s32_s19 = int_to_ptr.vmem [resolvable:$true] %s31_s19  ;;  %s646_s21 = int_to_ptr.vmem [resolvable:$true] %s19_s21 }
   0x5   :  { %s491_s24 = scalar_lea.hbm %s739_s1, 2048 }
   0x6   :  { %p492_p0 = scmp.ne.s32.totalorder %s739_s1, %s491_s24  ;;  %p495_p1 = scmp.lt.u32.totalorder %s491_s24, %s739_s1 }
   0x8   :  { %p497_p2 = pnand %p495_p1, %p492_p0 }
   0xa   :  { %500 = shalt.err (!%p497_p2)
}
   0xb   :  { %s501_s29 = scalar_lea.vmem %s32_s19, 2048  ;;  %p506_p4 = scmp.lt.s32.totalorder %s32_s19, %s32_s19 }
   0xc   :  { %p502_p3 = scmp.ne.s32.totalorder %s32_s19, %s501_s29  ;;  %p507_p5 = scmp.lt.s32.totalorder %s501_s29, %s501_s29 }
   0xe   :  { %p508_p6 = por %p507_p5, %p506_p4 }
  0x10   :  { %p509_p7 = pnand %p508_p6, %p502_p3 }
  0x12   :  { %512 = shalt.err (!%p509_p7)
}
  0x13   :  { %s611_s30 = smov 128   ;;  %s612_s6 = smov 8  }
  0x14   :  { %37 = dma.hbm_to_vmem [thread:$0]  %s739_s1, 2048, %s32_s19, [#allocation7], %s611_s30, %s611_s30, %s612_s6  }
  0x15   :  { %s513_s11 = scalar_lea.hbm %s738_s0, 256 }
  0x16   :  { %p514_p8 = scmp.ne.s32.totalorder %s738_s0, %s513_s11  ;;  %p517_p9 = scmp.lt.u32.totalorder %s513_s11, %s738_s0 }
  0x18   :  { %p519_p10 = pnand %p517_p9, %p514_p8 }
  0x1a   :  { %522 = shalt.err (!%p519_p10)
}
  0x1b   :  { %s523_s16 = scalar_lea.vmem %s646_s21, 256  ;;  %p528_p12 = scmp.lt.s32.totalorder %s646_s21, %s646_s21 }
  0x1c   :  { %p524_p11 = scmp.ne.s32.totalorder %s646_s21, %s523_s16  ;;  %p529_p13 = scmp.lt.s32.totalorder %s523_s16, %s523_s16 }
  0x1e   :  { %p530_p0 = por %p529_p13, %p528_p12 }
  0x20   :  { %p531_p1 = pnand %p530_p0, %p524_p11 }
  0x22   :  { %534 = shalt.err (!%p531_p1)
}
  0x23   :  { %25 = dma.hbm_to_vmem [thread:$0]  %s738_s0, 256, %s646_s21, [#allocation4], %s611_s30, %s611_s30, %s612_s6  }
  0x24   :  { %s613_s18 = smov [#allocation8]   ;;  %s614_s20 = smov [#allocation9]  }
  0x25   :  { %s45_s19 = sshll.u32 %s613_s18, 4  ;;  %s57_s22 = sshll.u32 %s614_s20, 4  ;;  %s46_s19 = int_to_ptr.vmem [resolvable:$true] %s45_s19  ;;  %s683_s22 = int_to_ptr.vmem [resolvable:$true] %s57_s22 }
  0x26   :  { %s535_s25 = scalar_lea.hbm %s741_s3, 256 }
  0x27   :  { %p536_p2 = scmp.ne.s32.totalorder %s741_s3, %s535_s25  ;;  %p539_p3 = scmp.lt.u32.totalorder %s535_s25, %s741_s3 }
  0x29   :  { %p541_p4 = pnand %p539_p3, %p536_p2 }
  0x2b   :  { %544 = shalt.err (!%p541_p4)
}
  0x2c   :  { %s545_s0 = scalar_lea.vmem %s46_s19, 256  ;;  %p550_p6 = scmp.lt.s32.totalorder %s46_s19, %s46_s19 }
  0x2d   :  { %p546_p5 = scmp.ne.s32.totalorder %s46_s19, %s545_s0  ;;  %p551_p7 = scmp.lt.s32.totalorder %s545_s0, %s545_s0 }
  0x2f   :  { %p552_p8 = por %p551_p7, %p550_p6 }
  0x31   :  { %p553_p9 = pnand %p552_p8, %p546_p5 }
  0x33   :  { %556 = shalt.err (!%p553_p9)
}
  0x34   :  { %51 = dma.hbm_to_vmem [thread:$0]  %s741_s3, 256, %s46_s19, [#allocation7], %s611_s30, %s611_s30, %s612_s6  }
  0x35   :  { %s557_s10 = scalar_lea.hbm %s742_s4, 2048 }
  0x36   :  { %p558_p10 = scmp.ne.s32.totalorder %s742_s4, %s557_s10  ;;  %p561_p11 = scmp.lt.u32.totalorder %s557_s10, %s742_s4 }
  0x38   :  { %p563_p12 = pnand %p561_p11, %p558_p10 }
  0x3a   :  { %566 = shalt.err (!%p563_p12)
}
  0x3b   :  { %s567_s15 = scalar_lea.vmem %s683_s22, 2048  ;;  %p572_p0 = scmp.lt.s32.totalorder %s683_s22, %s683_s22 }
  0x3c   :  { %p568_p13 = scmp.ne.s32.totalorder %s683_s22, %s567_s15  ;;  %p573_p1 = scmp.lt.s32.totalorder %s567_s15, %s567_s15 }
  0x3e   :  { %p574_p2 = por %p573_p1, %p572_p0 }
  0x40   :  { %p575_p3 = pnand %p574_p2, %p568_p13 }
  0x42   :  { %578 = shalt.err (!%p575_p3)
}
  0x43   :  { %63 = dma.hbm_to_vmem [thread:$0]  %s742_s4, 2048, %s683_s22, [#allocation10], %s611_s30, %s611_s30, %s612_s6  }
  0x44   :  { %601 = dma.done.wait [#allocation4], 256  }
  0x45   :  { %602 = vsyncadd [#allocation4], 4294967040 }
  0x46   :  { %603 = dma.done.wait [#allocation7], 2304  }
  0x47   :  { %604 = vsyncadd [#allocation7], 4294964992 }
  0x48   :  { %605 = dma.done.wait [#allocation10], 2048  }
  0x49   :  { %606 = vsyncadd [#allocation10], 4294965248  ;;  %v86_v0 = vld [vmem:[#allocation6] sm:$0xff]  ;;  %v87_v1 = vld [vmem:[#allocation6 + $0x8] sm:$0xff]  ;;  %s615_s17 = smov [#allocation11]  }
  0x4a   :  { %v186_v2 = vld [vmem:[#allocation9] sm:$0xff]  ;;  %v418_v3 = vpack.c.bf16 %v87_v1, %v86_v0  ;;  %v187_v4 = vld [vmem:[#allocation9 + $0x8] sm:$0xff]  ;;  %v188_v9 = vld [vmem:[#allocation9 + $0x10] sm:$0xff]  ;;  %s297_s18 = sshll.u32 %s615_s17, 4  ;;  %s298_s18 = int_to_ptr.vmem [resolvable:$true] %s297_s18 }
  0x4b   :  { %v88_v5 = vld [vmem:[#allocation6 + $0x10] sm:$0xff]  ;;  %v89_v6 = vld [vmem:[#allocation6 + $0x18] sm:$0xff]  ;;  %v450_v7 = vpack.c.bf16 %v187_v4, %v186_v2  ;;  %v189_v10 = vld [vmem:[#allocation9 + $0x18] sm:$0xff]  ;;  %s579_s19 = scalar_lea.vmem %s298_s18, 256  ;;  %p584_p5 = scmp.lt.s32.totalorder %s298_s18, %s298_s18 }
  0x4c   :  { %v422_v8 = vpack.c.bf16 %v89_v6, %v88_v5  ;;  %v90_v11 = vld [vmem:[#allocation6 + $0x20] sm:$0xff]  ;;  %419 = vmatprep.subr.bf16.mxu1 %v418_v3  ;;  %v454_v12 = vpack.c.bf16 %v189_v10, %v188_v9  ;;  %v91_v13 = vld [vmem:[#allocation6 + $0x28] sm:$0xff]  ;;  %v190_v14 = vld [vmem:[#allocation9 + $0x20] sm:$0xff]  ;;  %p580_p4 = scmp.ne.s32.totalorder %s298_s18, %s579_s19  ;;  %p585_p6 = scmp.lt.s32.totalorder %s579_s19, %s579_s19 }
  0x4d   :  { %v191_v15 = vld [vmem:[#allocation9 + $0x28] sm:$0xff]  ;;  %451 = vmatprep.subr.bf16.mxu0 %v450_v7  ;;  %421 = vmatpush3.bf16.msra.mxu1 %v418_v3  ;;  %v426_v16 = vpack.c.bf16 %v91_v13, %v90_v11  ;;  %v92_v18 = vld [vmem:[#allocation6 + $0x30] sm:$0xff]  ;;  %v192_v20 = vld [vmem:[#allocation9 + $0x30] sm:$0xff] }
  0x4e   :  { %453 = vmatpush3.bf16.msra.mxu0 %v450_v7  ;;  %423 = vmatprep.subr.bf16.mxu1 %v422_v8  ;;  %v458_v17 = vpack.c.bf16 %v191_v15, %v190_v14  ;;  %v93_v19 = vld [vmem:[#allocation6 + $0x38] sm:$0xff]  ;;  %v193_v21 = vld [vmem:[#allocation9 + $0x38] sm:$0xff]  ;;  %v94_v24 = vld [vmem:[#allocation6 + $0x40] sm:$0xff]  ;;  %p586_p7 = por %p585_p6, %p584_p5 }
  0x4f   :  { %455 = vmatprep.subr.bf16.mxu0 %v454_v12  ;;  %v430_v22 = vpack.c.bf16 %v93_v19, %v92_v18  ;;  %v462_v23 = vpack.c.bf16 %v193_v21, %v192_v20  ;;  %v95_v25 = vld [vmem:[#allocation6 + $0x48] sm:$0xff]  ;;  %v84_v26 = vld [vmem:[#allocation3] sm:$0xff]  ;;  %v195_v28 = vld [vmem:[#allocation9 + $0x48] sm:$0xff] }
  0x50   :  { %v194_v27 = vld [vmem:[#allocation9 + $0x40] sm:$0xff]  ;;  %380 = vmatprep.mubr.f32.mxu1 %v84_v26  ;;  %v184_v29 = vld [vmem:[#allocation8] sm:$0xff]  ;;  %v434_v30 = vpack.c.bf16 %v95_v25, %v94_v24  ;;  %v97_v33 = vld [vmem:[#allocation6 + $0x58] sm:$0xff]  ;;  %p587_p8 = pnand %p586_p7, %p580_p4 }
  0x51   :  { %425 = vmatpush3.bf16.msra.mxu1 %v422_v8  ;;  %415 = vmatprep.mubr.f32.mxu0 %v184_v29  ;;  %v466_v31 = vpack.c.bf16 %v195_v28, %v194_v27  ;;  %v96_v32 = vld [vmem:[#allocation6 + $0x50] sm:$0xff]  ;;  %v196_v34 = vld [vmem:[#allocation9 + $0x50] sm:$0xff]  ;;  %v197_v35 = vld [vmem:[#allocation9 + $0x58] sm:$0xff] }
  0x52   :  { %457 = vmatpush3.bf16.msra.mxu0 %v454_v12  ;;  %427 = vmatprep.subr.bf16.mxu1 %v426_v16  ;;  %v438_v36 = vpack.c.bf16 %v97_v33, %v96_v32  ;;  %v470_v37 = vpack.c.bf16 %v197_v35, %v196_v34  ;;  %v98_v38 = vld [vmem:[#allocation6 + $0x60] sm:$0xff]  ;;  %v99_v39 = vld [vmem:[#allocation6 + $0x68] sm:$0xff]  ;;  %v198_v40 = vld [vmem:[#allocation9 + $0x60] sm:$0xff] }
  0x53   :  { %459 = vmatprep.subr.bf16.mxu0 %v458_v17  ;;  %v199_v41 = vld [vmem:[#allocation9 + $0x68] sm:$0xff]  ;;  %v442_v42 = vpack.c.bf16 %v99_v39, %v98_v38  ;;  %v100_v44 = vld [vmem:[#allocation6 + $0x70] sm:$0xff]  ;;  %v200_v46 = vld [vmem:[#allocation9 + $0x70] sm:$0xff] }
  0x54   :  { %v474_v43 = vpack.c.bf16 %v199_v41, %v198_v40  ;;  %v101_v45 = vld [vmem:[#allocation6 + $0x78] sm:$0xff]  ;;  %v201_v47 = vld [vmem:[#allocation9 + $0x78] sm:$0xff]  ;;  %v311_v54 = vld [vmem:[%s740_s2] ss:$0 sm:$0xff] }
  0x55   :  { %429 = vmatpush3.bf16.msra.mxu1 %v426_v16  ;;  %v446_v48 = vpack.c.bf16 %v101_v45, %v100_v44  ;;  %v478_v49 = vpack.c.bf16 %v201_v47, %v200_v46  ;;  %v85_v50 = vld [vmem:[#allocation3 + $0x8] sm:$0xff]  ;;  %v185_v51 = vld [vmem:[#allocation8 + $0x8] sm:$0xff] }
  0x56   :  { %461 = vmatpush3.bf16.msra.mxu0 %v458_v17  ;;  %431 = vmatprep.subr.bf16.mxu1 %v430_v22 }
  0x57   :  { %463 = vmatprep.subr.bf16.mxu0 %v462_v23 }
  0x59   :  { %433 = vmatpush3.bf16.msra.mxu1 %v430_v22 }
  0x5a   :  { %465 = vmatpush3.bf16.msra.mxu0 %v462_v23  ;;  %435 = vmatprep.subr.bf16.mxu1 %v434_v30 }
  0x5b   :  { %467 = vmatprep.subr.bf16.mxu0 %v466_v31 }
  0x5d   :  { %437 = vmatpush3.bf16.msra.mxu1 %v434_v30 }
  0x5e   :  { %469 = vmatpush3.bf16.msra.mxu0 %v466_v31  ;;  %439 = vmatprep.subr.bf16.mxu1 %v438_v36 }
  0x5f   :  { %471 = vmatprep.subr.bf16.mxu0 %v470_v37 }
  0x61   :  { %441 = vmatpush3.bf16.msra.mxu1 %v438_v36 }
  0x62   :  { %473 = vmatpush3.bf16.msra.mxu0 %v470_v37  ;;  %443 = vmatprep.subr.bf16.mxu1 %v442_v42 }
  0x63   :  { %475 = vmatprep.subr.bf16.mxu0 %v474_v43 }
  0x65   :  { %445 = vmatpush3.bf16.msra.mxu1 %v442_v42 }
  0x66   :  { %477 = vmatpush3.bf16.msra.mxu0 %v474_v43  ;;  %447 = vmatprep.subr.bf16.mxu1 %v446_v48 }
  0x67   :  { %479 = vmatprep.subr.bf16.mxu0 %v478_v49 }
  0x69   :  { %449 = vmatpush3.bf16.msra.mxu1 %v446_v48 }
  0x6a   :  { %481 = vmatpush3.bf16.msra.mxu0 %v478_v49 }
  0x6c   :  { %381 = vmatmul.mubr.f32.vlgmr.msra.gmra.mrb[0].mxu1 %v85_v50 }
  0x6d   :  { %416 = vmatmul.mubr.f32.vlgmr.msra.gmra.mrb[0].mxu0 %v185_v51 }
 0x13f   :  { %v382_v52 = vpop.f32.mrb[0].mxu1 }
 0x140   :  { %v417_v53 = vpop.f32.mrb[0].mxu0  ;;  %v168_v55 = vpop.f32.mrb[1].mxu1 }
 0x141   :  { %v280_v56 = vadd.f32 %v417_v53, %v382_v52  ;;  %v268_v57 = vpop.f32.mrb[1].mxu0 }
 0x142   :  { %v279_v58 = vadd.f32 %v268_v57, %v168_v55 }
 0x143   :  { %v289_v59 = vadd.f32 %v311_v54, %v280_v56 }
 0x144   :  { %v288_v60 = vadd.f32 %v311_v54, %v279_v58 }
 0x145   :  { %291 = vst [vmem:[#allocation11 + $0x8] sm:$0xff] %v289_v59 }
 0x146   :  { %290 = vst [vmem:[#allocation11] sm:$0xff] %v288_v60 }
 0x147   :  { %590 = shalt.err (!%p587_p8)
}
 0x148   :  { %s591_s22 = scalar_lea.hbm %s743_s5, 256 }
 0x149   :  { %p592_p9 = scmp.ne.s32.totalorder %s743_s5, %s591_s22  ;;  %p595_p10 = scmp.lt.u32.totalorder %s591_s22, %s743_s5 }
 0x14b   :  { %p597_p11 = pnand %p595_p10, %p592_p9 }
 0x14d   :  { %600 = shalt.err (!%p597_p11)
}
 0x14e   :  { %303 = dma.vmem_to_hbm [thread:$0]  %s298_s18, 256, %s743_s5, [#allocation5], %s611_s30, %s611_s30, %s612_s6  }
 0x14f   :  { %607 = dma.done.wait [#allocation5], 256  }
 0x150   :  { %608 = vsyncadd [#allocation5], 4294967040 }
 0x151   :  { %307 = vsyncpa [#allocation4], 1 }
 0x152   :  { %308 = vsyncpa [#allocation7], 1 }
 0x153   :  { %309 = vsyncpa [#allocation10], 1 }
 0x154   :  { %310 = vsyncpa [#allocation5], 1 }

</bundles_post_ra>
